<compile_context>
chip_gen: v7x
topology: tpu7x:2x2x1
jax: 0.10.0
libtpu: 0.0.40
codegen_flags: <defaults>
</compile_context>

<pallas_src>
import jax
import jax.numpy as jnp
from jax.experimental import pallas as pl
from jax.experimental.pallas import tpu as pltpu

# Logical layer sizes.
D_IN, D_H1, D_H2, D_OUT = 111, 111, 56, 2
# Every layer dimension is padded to 128 lanes; weight slab is [w1 | w2 | w3].
LANE = 128
W_SLAB_COLS = 3 * LANE  # 384
SUB = 16  # row-tile granularity (bf16 sublane packing = 16 rows per vreg)


def _round_up(a, m):
    return -(-a // m) * m


def mlp_kernel(x_ref, w_ref, b_ref, o_ref):
    # x tile: (tb, 128) bf16 (already cast in the wrapper); accumulation stays f32.
    x = x_ref[...]

    # fc1 + ReLU   (w1 in cols [0:128))
    h1 = jnp.dot(x, w_ref[:, 0:128], preferred_element_type=jnp.float32) + b_ref[:, 0:128]
    h1 = jnp.maximum(h1, 0.0).astype(jnp.bfloat16)

    # fc2 + ReLU   (w2 in cols [128:256))
    h2 = jnp.dot(h1, w_ref[:, 128:256], preferred_element_type=jnp.float32) + b_ref[:, 128:256]
    h2 = jnp.maximum(h2, 0.0).astype(jnp.bfloat16)

    # fc3 (no activation)   (w3 in cols [256:384))
    h3 = jnp.dot(h2, w_ref[:, 256:384], preferred_element_type=jnp.float32) + b_ref[:, 256:384]
    o_ref[...] = h3.astype(o_ref.dtype)


def mlp_forward(x, w_slab, b_slab, *, tb_max=2048, split_threshold=512):
    """x: (batch, 111) f32. Returns (batch, 2) f32."""
    batch = x.shape[0]

    # --- batch tiling -------------------------------------------------------
    # pb0: batch rounded up to the bf16 row-tile granularity.
    pb0 = max(SUB, _round_up(batch, SUB))
    # Enough steps so each tile fits tb_max; force >=2 steps for non-trivial
    # batches so both v7x TensorCores participate ("parallel" grid axis).
    n_steps = pl.cdiv(pb0, tb_max)
    if pb0 >= split_threshold and n_steps < 2:
        n_steps = 2
    tb = _round_up(pl.cdiv(pb0, n_steps), SUB)
    pb = n_steps * tb
    grid = (n_steps,)

    # Lane-dense, zero-padded bf16 input slab (pb, 128): fused pad + cast, and
    # half the HBM bytes of an f32 slab.
    xp = jnp.zeros((pb, LANE), jnp.bfloat16).at[:batch, :D_IN].set(x.astype(jnp.bfloat16))

    flops = 2 * batch * (D_IN * D_H1 + D_H1 * D_H2 + D_H2 * D_OUT)
    bytes_accessed = (xp.size * 2) + (w_slab.size * 2) + (b_slab.size * 4) + (pb * LANE * 4)

    out = pl.pallas_call(
        mlp_kernel,
        out_shape=jax.ShapeDtypeStruct((pb, LANE), jnp.float32),
        grid_spec=pl.GridSpec(
            grid=grid,
            in_specs=[
                pl.BlockSpec((tb, LANE), lambda i: (i, 0)),            # x tile (bf16)
                pl.BlockSpec((LANE, W_SLAB_COLS), lambda i: (0, 0)),   # weight slab (resident)
                pl.BlockSpec((1, W_SLAB_COLS), lambda i: (0, 0)),      # bias slab (resident)
            ],
            out_specs=pl.BlockSpec((tb, LANE), lambda i: (i, 0)),
        ),
        compiler_params=pltpu.CompilerParams(dimension_semantics=("parallel",)),
        cost_estimate=pl.CostEstimate(
            flops=flops, transcendentals=0, bytes_accessed=bytes_accessed
        ),
    )(xp, w_slab, b_slab)

    return out[:batch, :D_OUT]


def init_params(key):
    """Deterministic init matching nn.Linear (uniform +-1/sqrt(fan_in)), stored [in, out]."""
    dims = [(D_IN, D_H1), (D_H1, D_H2), (D_H2, D_OUT)]
    params = []
    for fan_in, fan_out in dims:
        key, kw, kb = jax.random.split(key, 3)
        bound = 1.0 / jnp.sqrt(fan_in)
        w = jax.random.uniform(kw, (fan_in, fan_out), jnp.float32, -bound, bound)
        b = jax.random.uniform(kb, (1, fan_out), jnp.float32, -bound, bound)
        params.extend([w, b])
    return tuple(params)


def pack_params(params):
    """Zero-pad params to 128-lane blocks and pack into (weight_slab bf16, bias_slab f32)."""
    w1, b1, w2, b2, w3, b3 = params

    def pad_w(w):
        wp = jnp.zeros((LANE, LANE), jnp.float32)
        return wp.at[: w.shape[0], : w.shape[1]].set(w)

    def pad_b(b):
        bp = jnp.zeros((1, LANE), jnp.float32)
        return bp.at[:, : b.shape[1]].set(b)

    w_slab = jnp.concatenate([pad_w(w1), pad_w(w2), pad_w(w3)], axis=1).astype(jnp.bfloat16)
    b_slab = jnp.concatenate([pad_b(b1), pad_b(b2), pad_b(b3)], axis=1)  # stays f32
    return w_slab, b_slab


if __name__ == "__main__":
    key = jax.random.PRNGKey(0)
    key, kx = jax.random.split(key)

    batch = 8
    x = jax.random.normal(kx, (batch, D_IN), jnp.float32)

    params = init_params(key)
    w_slab, b_slab = pack_params(params)

    out = mlp_forward(x, w_slab, b_slab)
    out = jax.block_until_ready(out)

    # Reference in plain JAX with the same bf16 weight / bf16 activation casts,
    # f32 accumulation and f32 bias-add (matches kernel math).
    w1, b1, w2, b2, w3, b3 = params
    wb1, wb2, wb3 = (w.astype(jnp.bfloat16) for w in (w1, w2, w3))
    h = jnp.dot(x.astype(jnp.bfloat16), wb1, preferred_element_type=jnp.float32) + b1
    h = jnp.maximum(h, 0.0)
    h = jnp.dot(h.astype(jnp.bfloat16), wb2, preferred_element_type=jnp.float32) + b2
    h = jnp.maximum(h, 0.0)
    ref = jnp.dot(h.astype(jnp.bfloat16), wb3, preferred_element_type=jnp.float32) + b3

    assert out.shape == (batch, D_OUT)
    assert jnp.allclose(out, ref, atol=1e-3, rtol=1e-3), (
        f"max abs err = {jnp.max(jnp.abs(out - ref))}"
    )

    print("KERNEL_OK")
</pallas_src>

<mosaic_0001>
module attributes {stable_mosaic.version = 11 : i64} {
  func.func @mlp_kernel(%arg0: i32, %arg1: memref<16x128xbf16, #tpu.memory_space<vmem>>, %arg2: memref<128x384xbf16, #tpu.memory_space<vmem>>, %arg3: memref<1x384xf32, #tpu.memory_space<vmem>>, %arg4: memref<16x128xf32, #tpu.memory_space<vmem>>) attributes {dimension_semantics = [#tpu.dimension_semantics<parallel>], iteration_bounds = array<i64: 1>, scalar_prefetch = 0 : i64, scratch_operands = 0 : i64, tpu.core_type = #tpu.core_type<tc>, window_params = [{transform_indices = @transform_0, window_bounds = array<i64: 16, 128>}, {pipeline_mode = #tpu.pipeline_mode<synchronous>, transform_indices = @transform_1, window_bounds = array<i64: 128, 384>}, {pipeline_mode = #tpu.pipeline_mode<synchronous>, transform_indices = @transform_2, window_bounds = array<i64: 1, 384>}, {transform_indices = @transform_3, window_bounds = array<i64: 16, 128>}]} {
    %c0 = arith.constant 0 : index
    %c0_0 = arith.constant 0 : index
    %0 = vector.load %arg1[%c0, %c0_0] : memref<16x128xbf16, #tpu.memory_space<vmem>>, vector<16x128xbf16>
    %c0_1 = arith.constant 0 : index
    %c0_2 = arith.constant 0 : index
    %1 = vector.load %arg2[%c0_1, %c0_2] : memref<128x384xbf16, #tpu.memory_space<vmem>>, vector<128x128xbf16>
    %cst = arith.constant dense<0.000000e+00> : vector<16x128xf32>
    %2 = tpu.matmul %0, %1, %cst {dimension_numbers = #tpu.dot_dimension_numbers<[1], [0], [0], [1], [0, 0, 1, 1], [], []>} : vector<16x128xbf16>, vector<128x128xbf16>, vector<16x128xf32> -> vector<16x128xf32>
    %c0_3 = arith.constant 0 : index
    %c0_4 = arith.constant 0 : index
    %3 = vector.load %arg3[%c0_3, %c0_4] : memref<1x384xf32, #tpu.memory_space<vmem>>, vector<1x128xf32>
    %4 = vector.broadcast %3 : vector<1x128xf32> to vector<16x128xf32>
    %5 = arith.addf %2, %4 : vector<16x128xf32>
    %cst_5 = arith.constant 0.000000e+00 : f32
    %6 = vector.broadcast %cst_5 : f32 to vector<16x128xf32>
    %7 = arith.maximumf %5, %6 : vector<16x128xf32>
    %8 = arith.truncf %7 : vector<16x128xf32> to vector<16x128xbf16>
    %c0_6 = arith.constant 0 : index
    %c128 = arith.constant 128 : index
    %9 = vector.load %arg2[%c0_6, %c128] : memref<128x384xbf16, #tpu.memory_space<vmem>>, vector<128x128xbf16>
    %cst_7 = arith.constant dense<0.000000e+00> : vector<16x128xf32>
    %10 = tpu.matmul %8, %9, %cst_7 {dimension_numbers = #tpu.dot_dimension_numbers<[1], [0], [0], [1], [0, 0, 1, 1], [], []>} : vector<16x128xbf16>, vector<128x128xbf16>, vector<16x128xf32> -> vector<16x128xf32>
    %c0_8 = arith.constant 0 : index
    %c128_9 = arith.constant 128 : index
    %11 = vector.load %arg3[%c0_8, %c128_9] : memref<1x384xf32, #tpu.memory_space<vmem>>, vector<1x128xf32>
    %12 = vector.broadcast %11 : vector<1x128xf32> to vector<16x128xf32>
    %13 = arith.addf %10, %12 : vector<16x128xf32>
    %cst_10 = arith.constant 0.000000e+00 : f32
    %14 = vector.broadcast %cst_10 : f32 to vector<16x128xf32>
    %15 = arith.maximumf %13, %14 : vector<16x128xf32>
    %16 = arith.truncf %15 : vector<16x128xf32> to vector<16x128xbf16>
    %c0_11 = arith.constant 0 : index
    %c256 = arith.constant 256 : index
    %17 = vector.load %arg2[%c0_11, %c256] : memref<128x384xbf16, #tpu.memory_space<vmem>>, vector<128x128xbf16>
    %cst_12 = arith.constant dense<0.000000e+00> : vector<16x128xf32>
    %18 = tpu.matmul %16, %17, %cst_12 {dimension_numbers = #tpu.dot_dimension_numbers<[1], [0], [0], [1], [0, 0, 1, 1], [], []>} : vector<16x128xbf16>, vector<128x128xbf16>, vector<16x128xf32> -> vector<16x128xf32>
    %c0_13 = arith.constant 0 : index
    %c256_14 = arith.constant 256 : index
    %19 = vector.load %arg3[%c0_13, %c256_14] : memref<1x384xf32, #tpu.memory_space<vmem>>, vector<1x128xf32>
    %20 = vector.broadcast %19 : vector<1x128xf32> to vector<16x128xf32>
    %21 = arith.addf %18, %20 : vector<16x128xf32>
    %c0_15 = arith.constant 0 : index
    %c0_16 = arith.constant 0 : index
    %22 = vector.load %arg4[%c0_15, %c0_16] : memref<16x128xf32, #tpu.memory_space<vmem>>, vector<16x128xf32>
    tpu.vector_store %arg4[%c0_15, %c0_16], %21 {strides = array<i32>} : memref<16x128xf32, #tpu.memory_space<vmem>>, vector<16x128xf32>,
    return
  }
  func.func @transform_0(%arg0: i32) -> (i32, i32) {
    %c0_i32 = arith.constant 0 : i32
    %c0_i32_0 = arith.constant 0 : i32
    return %arg0, %c0_i32 : i32, i32
  }
  func.func @transform_1(%arg0: i32) -> (i32, i32) {
    %c0_i32 = arith.constant 0 : i32
    %c0_i32_0 = arith.constant 0 : i32
    %c0_i32_1 = arith.constant 0 : i32
    return %c0_i32, %c0_i32_0 : i32, i32
  }
  func.func @transform_2(%arg0: i32) -> (i32, i32) {
    %c0_i32 = arith.constant 0 : i32
    %c0_i32_0 = arith.constant 0 : i32
    %c0_i32_1 = arith.constant 0 : i32
    return %c0_i32, %c0_i32_0 : i32, i32
  }
  func.func @transform_3(%arg0: i32) -> (i32, i32) {
    %c0_i32 = arith.constant 0 : i32
    %c0_i32_0 = arith.constant 0 : i32
    return %arg0, %c0_i32 : i32, i32
  }
}

</mosaic_0001>

<bundles_post_ra>
// kernel: tpu_custom_call.1
= control target key start
LH: loop header
LB: loop body
LE: loop exit
PB: predicated region body
PF: predicated region fallthrough
CT: control target
= control target key end

     0   :  { %8 = vsyncpa [#allocation3], 0  ;;  %s743_s0 = inlined_call_operand.hbm [shape: bf16[16,128], index: 0, kind: input, shape index: {}]   ;;  %s744_s1 = inlined_call_operand.hbm [shape: bf16[128,384], index: 1, kind: input, shape index: {}]   ;;  %s745_s2 = inlined_call_operand.vmem [shape: f32[1,384], index: 2, kind: input, shape index: {}]   ;;  %s746_s3 = inlined_call_operand.hbm [shape: f32[16,128], index: 3, kind: output, shape index: {}]  }
   0x1   :  { %9 = vsyncpa [#allocation6], 0 }
   0x2   :  { %10 = vsyncpa [#allocation4], 0  ;;  %s637_s12 = smov [#allocation2]   ;;  %s565_s16 = scalar_lea.hbm %s743_s0, 128 }
   0x3   :  { %s16_s13 = sshll.u32 %s637_s12, 4  ;;  %p566_p0 = scmp.ne.s32.totalorder %s743_s0, %s565_s16  ;;  %s17_s13 = int_to_ptr.vmem [resolvable:$true] %s16_s13 }
   0x4   :  { %p569_p1 = scmp.lt.u32.totalorder %s565_s16, %s743_s0 }
   0x6   :  { %p571_p2 = pnand %p569_p1, %p566_p0 }
   0x8   :  { %574 = shalt.err (!%p571_p2)
}
   0x9   :  { %s575_s21 = scalar_lea.vmem %s17_s13, 128  ;;  %p580_p4 = scmp.lt.s32.totalorder %s17_s13, %s17_s13 }
   0xa   :  { %p576_p3 = scmp.ne.s32.totalorder %s17_s13, %s575_s21  ;;  %p581_p5 = scmp.lt.s32.totalorder %s575_s21, %s575_s21 }
   0xc   :  { %p582_p6 = por %p581_p5, %p580_p4 }
   0xe   :  { %p583_p7 = pnand %p582_p6, %p576_p3 }
  0x10   :  { %586 = shalt.err (!%p583_p7)
}
  0x11   :  { %s638_s22 = smov 64   ;;  %s639_s23 = smov 4  }
  0x12   :  { %22 = dma.hbm_to_vmem [thread:$0]  %s743_s0, 128, %s17_s13, [#allocation3], %s638_s22, %s638_s22, %s639_s23  }
  0x13   :  { %s640_s26 = smov [#allocation5]   ;;  %s587_s30 = scalar_lea.hbm %s744_s1, 3072 }
  0x14   :  { %s28_s27 = sshll.u32 %s640_s26, 4  ;;  %p588_p8 = scmp.ne.s32.totalorder %s744_s1, %s587_s30  ;;  %s29_s27 = int_to_ptr.vmem [resolvable:$true] %s28_s27 }
  0x15   :  { %p591_p9 = scmp.lt.u32.totalorder %s587_s30, %s744_s1 }
  0x17   :  { %p593_p10 = pnand %p591_p9, %p588_p8 }
  0x19   :  { %596 = shalt.err (!%p593_p10)
}
  0x1a   :  { %s597_s8 = scalar_lea.vmem %s29_s27, 3072  ;;  %p602_p12 = scmp.lt.s32.totalorder %s29_s27, %s29_s27 }
  0x1b   :  { %p598_p11 = scmp.ne.s32.totalorder %s29_s27, %s597_s8  ;;  %p603_p13 = scmp.lt.s32.totalorder %s597_s8, %s597_s8 }
  0x1d   :  { %p604_p0 = por %p603_p13, %p602_p12 }
  0x1f   :  { %p605_p1 = pnand %p604_p0, %p598_p11 }
  0x21   :  { %608 = shalt.err (!%p605_p1)
}
  0x22   :  { %s641_s0 = smov 192   ;;  %s642_s9 = smov 12  }
  0x23   :  { %34 = dma.hbm_to_vmem [thread:$0]  %s744_s1, 3072, %s29_s27, [#allocation6], %s641_s0, %s641_s0, %s642_s9  }
  0x24   :  { %631 = dma.done.wait [#allocation3], 128  }
  0x25   :  { %632 = vsyncadd [#allocation3], 4294967168 }
  0x26   :  { %633 = dma.done.wait [#allocation6], 3072  }
  0x27   :  { %634 = vsyncadd [#allocation6], 4294964224  ;;  %v643_v0 = vmov 0.0   ;;  %vm644_vm0 = vmmov 0   ;;  %v540_v1 = vld [vmem:[#allocation5] ss:$12 sps:$4 sm:$0xff]  }
  0x28   :  { %469 = vmatprep.subr.bf16.mxu0 %v643_v0  ;;  %485 = vmatprep.mubr.msk.bf16.mxu0 %vm644_vm0, %v643_v0  ;;  %v541_v2 = vld [vmem:[#allocation5 + $0x18] ss:$12 sps:$4 sm:$0xff]   ;;  %v542_v3 = vld [vmem:[#allocation5 + $0x30] ss:$12 sps:$4 sm:$0xff]   ;;  %v543_v5 = vld [vmem:[#allocation5 + $0x48] ss:$12 sps:$4 sm:$0xff]  }
  0x29   :  { %489 = vmatprep.subr.bf16.mxu1 %v643_v0  ;;  %505 = vmatprep.mubr.msk.bf16.mxu1 %vm644_vm0, %v643_v0  ;;  %v549_v4 = vld [vmem:[#allocation5 + $0x4] ss:$12 sps:$4 sm:$0xff]   ;;  %v550_v6 = vld [vmem:[#allocation5 + $0x1c] ss:$12 sps:$4 sm:$0xff]   ;;  %v544_v7 = vld [vmem:[#allocation5 + $0x60] ss:$12 sps:$4 sm:$0xff]  }
  0x2a   :  { %470 = vmatpush3.bf16.msra.mxu0 %v540_v1  ;;  %490 = vmatpush3.bf16.msra.mxu1 %v549_v4  ;;  %v551_v8 = vld [vmem:[#allocation5 + $0x34] ss:$12 sps:$4 sm:$0xff]   ;;  %v545_v9 = vld [vmem:[#allocation5 + $0x78] ss:$12 sps:$4 sm:$0xff]   ;;  %v546_v11 = vld [vmem:[#allocation5 + $0x90] ss:$12 sps:$4 sm:$0xff]  }
  0x2b   :  { %471 = vmatprep.subr.bf16.mxu0 %v643_v0  ;;  %491 = vmatprep.subr.bf16.mxu1 %v643_v0  ;;  %v552_v10 = vld [vmem:[#allocation5 + $0x4c] ss:$12 sps:$4 sm:$0xff]   ;;  %v553_v12 = vld [vmem:[#allocation5 + $0x64] ss:$12 sps:$4 sm:$0xff]   ;;  %v547_v13 = vld [vmem:[#allocation5 + $0xa8] ss:$12 sps:$4 sm:$0xff]  }
  0x2c   :  { %v554_v14 = vld [vmem:[#allocation5 + $0x7c] ss:$12 sps:$4 sm:$0xff]   ;;  %v555_v16 = vld [vmem:[#allocation5 + $0x94] ss:$12 sps:$4 sm:$0xff]   ;;  %v556_v17 = vld [vmem:[#allocation5 + $0xac] ss:$12 sps:$4 sm:$0xff]  }
  0x2d   :  { %v548_v15 = vld [vmem:[#allocation2] sm:$0xff]   ;;  %v557_v18 = vld [vmem:[#allocation5 + $0x8] ss:$12 sps:$4 sm:$0xff]   ;;  %v558_v19 = vld [vmem:[#allocation5 + $0x20] ss:$12 sps:$4 sm:$0xff]   ;;  %s645_s17 = smov [#allocation7]  }
  0x2e   :  { %472 = vmatpush3.bf16.msra.mxu0 %v541_v2  ;;  %492 = vmatpush3.bf16.msra.mxu1 %v550_v6  ;;  %v559_v20 = vld [vmem:[#allocation5 + $0x38] ss:$12 sps:$4 sm:$0xff]   ;;  %v560_v21 = vld [vmem:[#allocation5 + $0x50] ss:$12 sps:$4 sm:$0xff]   ;;  %v561_v22 = vld [vmem:[#allocation5 + $0x68] ss:$12 sps:$4 sm:$0xff]  }
  0x2f   :  { %473 = vmatprep.subr.bf16.mxu0 %v643_v0  ;;  %493 = vmatprep.subr.bf16.mxu1 %v643_v0  ;;  %v562_v23 = vld [vmem:[#allocation5 + $0x80] ss:$12 sps:$4 sm:$0xff]   ;;  %v414_v24 = vld [vmem:[%s745_s2] ss:$0 sm:$0xff]  ;;  %v564_v35 = vld [vmem:[#allocation5 + $0xb0] ss:$12 sps:$4 sm:$0xff]  }
  0x30   :  { %v563_v34 = vld [vmem:[#allocation5 + $0x98] ss:$12 sps:$4 sm:$0xff]   ;;  %s401_s18 = sshll.u32 %s645_s17, 4  ;;  %s402_s18 = int_to_ptr.vmem [resolvable:$true] %s401_s18 }
  0x31   :  { %v424_v36 = vld [vmem:[%s745_s2 + $0x1] ss:$0 sm:$0xff]  ;;  %v433_v46 = vld [vmem:[%s745_s2 + $0x2] ss:$0 sm:$0xff]  ;;  %s609_s19 = scalar_lea.vmem %s402_s18, 256  ;;  %p614_p3 = scmp.lt.s32.totalorder %s402_s18, %s402_s18 }
  0x32   :  { %474 = vmatpush3.bf16.msra.mxu0 %v542_v3  ;;  %494 = vmatpush3.bf16.msra.mxu1 %v551_v8  ;;  %p610_p2 = scmp.ne.s32.totalorder %s402_s18, %s609_s19  ;;  %p615_p4 = scmp.lt.s32.totalorder %s609_s19, %s609_s19 }
  0x33   :  { %475 = vmatprep.subr.bf16.mxu0 %v643_v0  ;;  %495 = vmatprep.subr.bf16.mxu1 %v643_v0 }
  0x34   :  { %p616_p5 = por %p615_p4, %p614_p3 }
  0x36   :  { %476 = vmatpush3.bf16.msra.mxu0 %v543_v5  ;;  %496 = vmatpush3.bf16.msra.mxu1 %v552_v10  ;;  %p617_p6 = pnand %p616_p5, %p610_p2 }
  0x37   :  { %477 = vmatprep.subr.bf16.mxu0 %v643_v0  ;;  %497 = vmatprep.subr.bf16.mxu1 %v643_v0 }
  0x3a   :  { %478 = vmatpush3.bf16.msra.mxu0 %v544_v7  ;;  %498 = vmatpush3.bf16.msra.mxu1 %v553_v12 }
  0x3b   :  { %479 = vmatprep.subr.bf16.mxu0 %v643_v0  ;;  %499 = vmatprep.subr.bf16.mxu1 %v643_v0 }
  0x3e   :  { %480 = vmatpush3.bf16.msra.mxu0 %v545_v9  ;;  %500 = vmatpush3.bf16.msra.mxu1 %v554_v14 }
  0x3f   :  { %481 = vmatprep.subr.bf16.mxu0 %v643_v0  ;;  %501 = vmatprep.subr.bf16.mxu1 %v643_v0 }
  0x42   :  { %482 = vmatpush3.bf16.msra.mxu0 %v546_v11  ;;  %502 = vmatpush3.bf16.msra.mxu1 %v555_v16 }
  0x43   :  { %483 = vmatprep.subr.bf16.mxu0 %v643_v0  ;;  %503 = vmatprep.subr.bf16.mxu1 %v643_v0 }
  0x46   :  { %484 = vmatpush3.bf16.msra.mxu0 %v547_v13  ;;  %504 = vmatpush3.bf16.msra.mxu1 %v556_v17 }
  0x47   :  { %509 = vmatprep.subr.bf16.mxu0 %v643_v0 }
  0x49   :  { %486 = vmatmul.mubr.bf16.vlgmr.msra.gmra.mrb[0].mxu0 %v548_v15 }
  0x4a   :  { %525 = vmatprep.mubr.msk.bf16.mxu0 %vm644_vm0, %v643_v0  ;;  %510 = vmatpush3.bf16.msra.mxu0 %v557_v18 }
  0x4b   :  { %511 = vmatprep.subr.bf16.mxu0 %v643_v0 }
  0x4e   :  { %512 = vmatpush3.bf16.msra.mxu0 %v558_v19 }
  0x4f   :  { %513 = vmatprep.subr.bf16.mxu0 %v643_v0 }
  0x52   :  { %514 = vmatpush3.bf16.msra.mxu0 %v559_v20 }
  0x53   :  { %515 = vmatprep.subr.bf16.mxu0 %v643_v0 }
  0x56   :  { %516 = vmatpush3.bf16.msra.mxu0 %v560_v21 }
  0x57   :  { %517 = vmatprep.subr.bf16.mxu0 %v643_v0 }
  0x5a   :  { %518 = vmatpush3.bf16.msra.mxu0 %v561_v22 }
  0x5b   :  { %519 = vmatprep.subr.bf16.mxu0 %v643_v0 }
  0x5e   :  { %520 = vmatpush3.bf16.msra.mxu0 %v562_v23 }
  0x5f   :  { %521 = vmatprep.subr.bf16.mxu0 %v643_v0 }
  0x62   :  { %522 = vmatpush3.bf16.msra.mxu0 %v563_v34 }
  0x63   :  { %523 = vmatprep.subr.bf16.mxu0 %v643_v0 }
  0x66   :  { %524 = vmatpush3.bf16.msra.mxu0 %v564_v35 }
 0x11c   :  { %v157_v25 = vpop.f32.mrb[0].mxu0 }
 0x11d   :  { %v158_v26 = vadd.f32 %v414_v24, %v157_v25  ;;  %v487_v27 = vpop.f32.mrb[1].mxu0 }
 0x11e   :  { %v160_v28 = vpop.f32.mrb[2].mxu0 }
 0x11f   :  { %v161_v29 = vadd.f32 %v414_v24, %v160_v28  ;;  %v488_v30 = vpop.f32.mrb[3].mxu0  ;;  %v164_v31 = vmax.f32 %v158_v26, 0.0 }
 0x121   :  { %v165_v32 = vmax.f32 %v161_v29, 0.0 }
 0x123   :  { %v166_v33 = vpack.c.bf16 %v165_v32, %v164_v31 }
 0x125   :  { %506 = vmatmul.mubr.bf16.vlgmr.msra.gmra.mrb[0].mxu1 %v166_v33 }
 0x1f8   :  { %v272_v37 = vpop.f32.mrb[0].mxu1 }
 0x1f9   :  { %v273_v38 = vadd.f32 %v424_v36, %v272_v37  ;;  %v507_v39 = vpop.f32.mrb[1].mxu1 }
 0x1fa   :  { %v275_v40 = vpop.f32.mrb[2].mxu1 }
 0x1fb   :  { %v276_v41 = vadd.f32 %v424_v36, %v275_v40  ;;  %v508_v42 = vpop.f32.mrb[3].mxu1  ;;  %v279_v43 = vmax.f32 %v273_v38, 0.0 }
 0x1fd   :  { %v280_v44 = vmax.f32 %v276_v41, 0.0 }
 0x1ff   :  { %v281_v45 = vpack.c.bf16 %v280_v44, %v279_v43 }
 0x201   :  { %526 = vmatmul.mubr.bf16.vlgmr.msra.gmra.mrb[4].mxu0 %v281_v45 }
 0x2d4   :  { %v387_v47 = vpop.f32.mrb[4].mxu0 }
 0x2d5   :  { %v388_v48 = vadd.f32 %v433_v46, %v387_v47  ;;  %v527_v49 = vpop.f32.mrb[5].mxu0 }
 0x2d6   :  { %v390_v50 = vpop.f32.mrb[6].mxu0 }
 0x2d7   :  { %394 = vst [vmem:[#allocation7] sm:$0xff] %v388_v48  ;;  %v391_v51 = vadd.f32 %v433_v46, %v390_v50  ;;  %v528_v52 = vpop.f32.mrb[7].mxu0 }
 0x2d9   :  { %395 = vst [vmem:[#allocation7 + $0x8] sm:$0xff] %v391_v51 }
 0x2da   :  { %620 = shalt.err (!%p617_p6)
}
 0x2db   :  { %s621_s21 = scalar_lea.hbm %s746_s3, 256 }
 0x2dc   :  { %p622_p7 = scmp.ne.s32.totalorder %s746_s3, %s621_s21  ;;  %p625_p8 = scmp.lt.u32.totalorder %s621_s21, %s746_s3 }
 0x2de   :  { %p627_p9 = pnand %p625_p8, %p622_p7 }
 0x2e0   :  { %630 = shalt.err (!%p627_p9)
}
 0x2e1   :  { %s646_s26 = smov 128   ;;  %s647_s27 = smov 8  }
 0x2e2   :  { %407 = dma.vmem_to_hbm [thread:$0]  %s402_s18, 256, %s746_s3, [#allocation4], %s646_s26, %s646_s26, %s647_s27  }
 0x2e3   :  { %635 = dma.done.wait [#allocation4], 256  }
 0x2e4   :  { %636 = vsyncadd [#allocation4], 4294967040 }
 0x2e5   :  { %411 = vsyncpa [#allocation3], 1 }
 0x2e6   :  { %412 = vsyncpa [#allocation6], 1 }
 0x2e7   :  { %413 = vsyncpa [#allocation4], 1 }

</bundles_post_ra>
